<compile_context>
chip_gen: v7x
topology: tpu7x:2x2x1
jax: 0.10.0
libtpu: 0.0.40
codegen_flags: <defaults>
</compile_context>

<pallas_src>
import functools

import jax
import jax.numpy as jnp
from jax.experimental import pallas as pl
from jax.experimental.pallas import tpu as pltpu


# ---------------------------------------------------------------------------
# Hardware / tiling helpers.
# ---------------------------------------------------------------------------
def _tpu_vmem_bytes():
    try:
        return int(pltpu.get_tpu_info().vmem_capacity_bytes)
    except Exception:
        return 64 * 1024 * 1024  # conservative (v7x per-TC VMEM)


def _divisors(n):
    return [d for d in range(1, n + 1) if n % d == 0]


def _aligned_tile(n, align, max_tile):
    """Largest divisor of n that is a multiple of `align` and <= max_tile.
    Falls back to the full dimension (always layout-legal for Mosaic)."""
    if n <= max_tile:
        return n
    t = (max_tile // align) * align
    while t >= align:
        if n % t == 0:
            return t
        t -= align
    return n


def _lstm_tiles(T, B, Din, H, time_tile, batch_tile, vmem_cap):
    """Pick (bt, tt) under an explicit VMEM budget (review items 3-5)."""
    budget = int(vmem_cap * 0.45)

    def bytes_needed(bt, tt):
        stream = 2 * tt * bt * (Din + H) * 2            # bf16 x-in + h-out, double-buffered
        weights = (Din + H) * 4 * H * 2 + 4 * H * 4     # resident W_ih, W_hh (bf16) + bias
        scratch = 2 * bt * H * 4                        # h/c carries (f32)
        live = 2 * bt * 4 * H * 4                       # per-step gate pre-activations (f32)
        return stream + weights + scratch + live

    bdivs = _divisors(B)
    if batch_tile is not None:
        bt = batch_tile
    else:
        # Large bt = more MXU rows per serial step.  Keep >= 2 batch tiles when
        # B is big enough so a second TensorCore (v7x) can share the recurrence.
        cap = B if B < 16 else B // 2
        cands = [d for d in bdivs if d <= cap and (d == B or d % 8 == 0)]
        fitting = [d for d in cands if bytes_needed(d, 4) <= budget]
        if fitting:
            bt = max(fitting)
        elif cands:
            bt = min(cands)
        else:
            bt = B  # full batch in one tile (always layout-legal)

    if time_tile is not None:
        tt = time_tile
    else:
        tdivs = _divisors(T)
        tt = max([d for d in tdivs if d <= 8 and bytes_needed(bt, d) <= budget] or [1])

    assert B % bt == 0 and T % tt == 0, (B, bt, T, tt)
    return bt, tt


# ---------------------------------------------------------------------------
# Recurrent LSTM kernel (input projection fused).
#   grid = (batch_tiles, time_chunks); TT timesteps per grid step, statically
#   unrolled.  Gate column order is (i, f, o, g) -> one wide sigmoid slice.
# ---------------------------------------------------------------------------
def _lstm_recurrent_kernel(x_ref, w_ih_ref, w_hh_ref, b_ref, out_ref,
                           h_scr, c_scr, *, hidden, tt):
    # Reset the carries at the start of each batch tile's time sweep.
    @pl.when(pl.program_id(1) == 0)
    def _():
        h_scr[...] = jnp.zeros_like(h_scr)
        c_scr[...] = jnp.zeros_like(c_scr)

    H = hidden
    bt = out_ref.shape[1]
    w_ih = w_ih_ref[...]                                  # (Din, 4H) bf16, resident
    w_hh = w_hh_ref[...]                                  # (H, 4H)  bf16, resident
    bias = jnp.broadcast_to(b_ref[...], (bt, 4 * H))      # hoisted (no per-iter broadcast)
    h = h_scr[...]                                        # (bt, H) f32
    c = c_scr[...]                                        # (bt, H) f32

    for i in range(tt):  # static unroll: visible to the LLO scheduler
        # x_t @ W_ih is independent of the h->h chain; fused here so gx never
        # round-trips through HBM (previously a separate pallas_call).
        gx = jnp.dot(x_ref[i], w_ih, preferred_element_type=jnp.float32) + bias
        gates = gx + jnp.dot(h.astype(w_hh.dtype), w_hh,
                             preferred_element_type=jnp.float32)
        sig = jax.nn.sigmoid(gates[:, :3 * H])            # one wide EUP push (i|f|o)
        i_g = sig[:, 0 * H:1 * H]
        f_g = sig[:, 1 * H:2 * H]
        o_g = sig[:, 2 * H:3 * H]
        g_g = jnp.tanh(gates[:, 3 * H:])
        c = f_g * c + i_g * g_g
        h = o_g * jnp.tanh(c)
        out_ref[i] = h.astype(out_ref.dtype)

    h_scr[...] = h
    c_scr[...] = c


def lstm_layer(x_tbd, w_ih_t, w_hh_t, bias, *, time_tile=None, batch_tile=None,
               out_dtype=jnp.bfloat16):
    """x_tbd: (T, B, Din) bf16 time-major;  w_*_t: (Din|H, 4H) bf16;  bias: (1, 4H) f32.
    Returns (T, B, H) in `out_dtype`."""
    T, B, Din = x_tbd.shape
    H = w_hh_t.shape[0]
    vmem_cap = _tpu_vmem_bytes()
    bt, tt = _lstm_tiles(T, B, Din, H, time_tile, batch_tile, vmem_cap)

    kernel = functools.partial(_lstm_recurrent_kernel, hidden=H, tt=tt)
    return pl.pallas_call(
        kernel,
        out_shape=jax.ShapeDtypeStruct((T, B, H), out_dtype),
        grid_spec=pltpu.PrefetchScalarGridSpec(
            num_scalar_prefetch=0,
            grid=(B // bt, T // tt),
            in_specs=[
                pl.BlockSpec((tt, bt, Din), lambda b, t: (t, b, 0)),
                pl.BlockSpec((Din, 4 * H), lambda b, t: (0, 0)),
                pl.BlockSpec((H, 4 * H), lambda b, t: (0, 0)),
                pl.BlockSpec((1, 4 * H), lambda b, t: (0, 0)),
            ],
            out_specs=pl.BlockSpec((tt, bt, H), lambda b, t: (t, b, 0)),
            scratch_shapes=[
                pltpu.VMEM((bt, H), jnp.float32),  # h carry
                pltpu.VMEM((bt, H), jnp.float32),  # c carry
            ],
        ),
        compiler_params=pltpu.CompilerParams(
            # batch tiles are independent (second TC on v7x); time is the
            # sequential recurrence.
            dimension_semantics=("parallel", "arbitrary"),
            vmem_limit_bytes=int(vmem_cap * 0.85),
        ),
    )(x_tbd, w_ih_t, w_hh_t, bias)


# ---------------------------------------------------------------------------
# Final linear (fc): tiled matmul + bias.  Grid ordered so the larger of
# {X, W_fc} is resident on the outer axis and only the smaller is re-streamed.
# ---------------------------------------------------------------------------
def _fc_kernel(x_ref, w_ref, b_ref, o_ref):
    o_ref[...] = (
        jnp.dot(x_ref[...], w_ref[...], preferred_element_type=jnp.float32)
        + b_ref[...]
    ).astype(o_ref.dtype)


def fc_layer(x_2d, w_t, bias):
    """x_2d: (N, H) bf16;  w_t: (H, V) bf16;  bias: (1, V) f32 -> (N, V) f32."""
    N, H = x_2d.shape
    V = w_t.shape[1]
    rn = _aligned_tile(N, 8, 512)
    vt = _aligned_tile(V, 128, 1024)
    vmem_cap = _tpu_vmem_bytes()

    x_bytes = N * H * x_2d.dtype.itemsize
    w_bytes = H * V * w_t.dtype.itemsize
    if x_bytes <= w_bytes:
        # Weight tiles on the outer axis (fetched once each); the smaller X is
        # re-streamed across the inner axis.
        grid = (V // vt, N // rn)
        in_specs = [pl.BlockSpec((rn, H), lambda j, i: (i, 0)),
                    pl.BlockSpec((H, vt), lambda j, i: (0, j)),
                    pl.BlockSpec((1, vt), lambda j, i: (0, j))]
        out_spec = pl.BlockSpec((rn, vt), lambda j, i: (i, j))
    else:
        grid = (N // rn, V // vt)
        in_specs = [pl.BlockSpec((rn, H), lambda i, j: (i, 0)),
                    pl.BlockSpec((H, vt), lambda i, j: (0, j)),
                    pl.BlockSpec((1, vt), lambda i, j: (0, j))]
        out_spec = pl.BlockSpec((rn, vt), lambda i, j: (i, j))

    return pl.pallas_call(
        _fc_kernel,
        out_shape=jax.ShapeDtypeStruct((N, V), jnp.float32),
        grid_spec=pltpu.PrefetchScalarGridSpec(
            num_scalar_prefetch=0,
            grid=grid,
            in_specs=in_specs,
            out_specs=out_spec,
        ),
        compiler_params=pltpu.CompilerParams(
            dimension_semantics=("parallel", "parallel"),
            vmem_limit_bytes=int(vmem_cap * 0.85),
        ),
    )(x_2d, w_t, bias)


# ---------------------------------------------------------------------------
# Parameters.  Raw (PyTorch-layout, f32) params + kernel-format prep
# (gate reorder i,f,g,o -> i,f,o,g; transpose; bf16 weights).
# ---------------------------------------------------------------------------
def init_raw_params(key, vocab_size, embedding_dim, hidden_dim, num_layers):
    keys = jax.random.split(key, 3 + 4 * num_layers)
    bound = 1.0 / (hidden_dim ** 0.5)
    raw = {"embedding": jax.random.normal(keys[0], (vocab_size, embedding_dim), jnp.float32)}
    layers = []
    for layer in range(num_layers):
        din = embedding_dim if layer == 0 else hidden_dim
        k = keys[3 + 4 * layer: 3 + 4 * (layer + 1)]
        layers.append({
            "w_ih": jax.random.uniform(k[0], (4 * hidden_dim, din), jnp.float32, -bound, bound),
            "w_hh": jax.random.uniform(k[1], (4 * hidden_dim, hidden_dim), jnp.float32, -bound, bound),
            "b_ih": jax.random.uniform(k[2], (4 * hidden_dim,), jnp.float32, -bound, bound),
            "b_hh": jax.random.uniform(k[3], (4 * hidden_dim,), jnp.float32, -bound, bound),
        })
    raw["lstm"] = layers
    raw["fc_w"] = jax.random.uniform(keys[1], (vocab_size, hidden_dim), jnp.float32, -bound, bound)
    raw["fc_b"] = jax.random.uniform(keys[2], (vocab_size,), jnp.float32, -bound, bound)
    return raw


def _reorder_ifgo_to_ifog(w):
    """PyTorch gate order (i, f, g, o) -> kernel order (i, f, o, g) along axis 0."""
    i, f, g, o = jnp.split(w, 4, axis=0)
    return jnp.concatenate([i, f, o, g], axis=0)


def prepare_params(raw, compute_dtype=jnp.bfloat16):
    params = {"embedding": raw["embedding"].astype(compute_dtype)}
    layers = []
    for lyr in raw["lstm"]:
        w_ih = _reorder_ifgo_to_ifog(lyr["w_ih"])
        w_hh = _reorder_ifgo_to_ifog(lyr["w_hh"])
        b = _reorder_ifgo_to_ifog(lyr["b_ih"] + lyr["b_hh"])
        layers.append({
            "w_ih_t": w_ih.T.astype(compute_dtype),                  # (Din, 4H) [i|f|o|g]
            "w_hh_t": w_hh.T.astype(compute_dtype),                  # (H, 4H)
            "bias": b.reshape(1, -1).astype(jnp.float32),            # (1, 4H)
        })
    params["lstm"] = layers
    params["fc_w_t"] = raw["fc_w"].T.astype(compute_dtype)           # (H, V)
    params["fc_b"] = raw["fc_b"].reshape(1, -1).astype(jnp.float32)  # (1, V)
    return params


# ---------------------------------------------------------------------------
# Forward pass.  Activations stay time-major (T, B, feature) through all LSTM
# layers; the batch_first layout fix is done on the cheap H-wide tensor before
# the FC (no V-wide logits transpose).
# ---------------------------------------------------------------------------
@jax.jit
def recipe_lstm_forward(tokens, params):
    B, T = tokens.shape
    x = jnp.take(params["embedding"], tokens.T, axis=0)           # (T, B, E) bf16, time-major
    for layer in params["lstm"]:
        x = lstm_layer(x, layer["w_ih_t"], layer["w_hh_t"], layer["bias"])  # (T, B, H) bf16
    # dropout(0.4): identity in eval mode
    # TODO(synk): pltpu.prng_* based dropout for training-mode semantics.
    H = x.shape[-1]
    x_bth = jnp.transpose(x, (1, 0, 2)).reshape(B * T, H)         # cheap (H-wide) layout fix
    logits = fc_layer(x_bth, params["fc_w_t"], params["fc_b"])    # (B*T, V) f32
    V = logits.shape[-1]
    return logits.reshape(B, T, V)


# ---------------------------------------------------------------------------
# Pure-JAX reference (lax.scan, f32, PyTorch gate order).  Weights are rounded
# through bf16 so only activation-precision differences remain vs the kernel.
# ---------------------------------------------------------------------------
def recipe_lstm_ref(tokens, raw):
    def rt(w):
        return w.astype(jnp.bfloat16).astype(jnp.float32)

    B, T = tokens.shape
    x = jnp.take(rt(raw["embedding"]), tokens.T, axis=0)          # (T, B, E)
    for lyr in raw["lstm"]:
        H = lyr["w_hh"].shape[1]
        w_ih_t = rt(lyr["w_ih"]).T
        w_hh_t = rt(lyr["w_hh"]).T
        bias = (lyr["b_ih"] + lyr["b_hh"]).reshape(1, -1)

        def step(carry, x_t):
            h, c = carry
            gates = x_t @ w_ih_t + h @ w_hh_t + bias
            i = jax.nn.sigmoid(gates[:, 0 * H:1 * H])
            f = jax.nn.sigmoid(gates[:, 1 * H:2 * H])
            g = jnp.tanh(gates[:, 2 * H:3 * H])
            o = jax.nn.sigmoid(gates[:, 3 * H:4 * H])
            c = f * c + i * g
            h = o * jnp.tanh(c)
            return (h, c), h

        init = (jnp.zeros((B, H), jnp.float32), jnp.zeros((B, H), jnp.float32))
        _, x = jax.lax.scan(step, init, x)
    h_bth = jnp.transpose(x, (1, 0, 2))                           # (B, T, H)
    return h_bth @ rt(raw["fc_w"]).T + raw["fc_b"].reshape(1, 1, -1)


if __name__ == "__main__":
    vocab_size = 128
    embedding_dim = 32
    hidden_dim = 32
    num_layers = 2
    batch = 2
    seq = 8

    key = jax.random.PRNGKey(0)
    k_tok, k_param = jax.random.split(key)
    tokens = jax.random.randint(k_tok, (batch, seq), 0, vocab_size, dtype=jnp.int32)
    raw = init_raw_params(k_param, vocab_size, embedding_dim, hidden_dim, num_layers)
    params = prepare_params(raw)

    out = recipe_lstm_forward(tokens, params)
    out = jax.block_until_ready(out)
    assert out.shape == (batch, seq, vocab_size), out.shape

    ref = recipe_lstm_ref(tokens, raw)
    err = float(jnp.max(jnp.abs(out - ref)))
    assert err < 5e-2, err

    print("KERNEL_OK")
</pallas_src>

<mosaic_0001>
module attributes {stable_mosaic.version = 11 : i64} {
  func.func @_fc_kernel(%arg0: i32, %arg1: i32, %arg2: memref<16x32xbf16, #tpu.memory_space<vmem>>, %arg3: memref<32x128xbf16, #tpu.memory_space<vmem>>, %arg4: memref<1x128xf32, #tpu.memory_space<vmem>>, %arg5: memref<16x128xf32, #tpu.memory_space<vmem>>) attributes {dimension_semantics = [#tpu.dimension_semantics<parallel>, #tpu.dimension_semantics<parallel>], iteration_bounds = array<i64: 1, 1>, scalar_prefetch = 0 : i64, scratch_operands = 0 : i64, tpu.core_type = #tpu.core_type<tc>, window_params = [{transform_indices = @transform_0, window_bounds = array<i64: 16, 32>}, {transform_indices = @transform_1, window_bounds = array<i64: 32, 128>}, {transform_indices = @transform_2, window_bounds = array<i64: 1, 128>}, {transform_indices = @transform_3, window_bounds = array<i64: 16, 128>}]} {
    %c0 = arith.constant 0 : index
    %c0_0 = arith.constant 0 : index
    %0 = vector.load %arg2[%c0, %c0_0] : memref<16x32xbf16, #tpu.memory_space<vmem>>, vector<16x32xbf16>
    %c0_1 = arith.constant 0 : index
    %c0_2 = arith.constant 0 : index
    %1 = vector.load %arg3[%c0_1, %c0_2] : memref<32x128xbf16, #tpu.memory_space<vmem>>, vector<32x128xbf16>
    %cst = arith.constant dense<0.000000e+00> : vector<16x128xf32>
    %2 = tpu.matmul %0, %1, %cst {dimension_numbers = #tpu.dot_dimension_numbers<[1], [0], [0], [1], [0, 0, 1, 1], [], []>} : vector<16x32xbf16>, vector<32x128xbf16>, vector<16x128xf32> -> vector<16x128xf32>
    %c0_3 = arith.constant 0 : index
    %c0_4 = arith.constant 0 : index
    %3 = vector.load %arg4[%c0_3, %c0_4] : memref<1x128xf32, #tpu.memory_space<vmem>>, vector<1x128xf32>
    %4 = vector.broadcast %3 : vector<1x128xf32> to vector<16x128xf32>
    %5 = arith.addf %2, %4 : vector<16x128xf32>
    %c0_5 = arith.constant 0 : index
    %c0_6 = arith.constant 0 : index
    %6 = vector.load %arg5[%c0_5, %c0_6] : memref<16x128xf32, #tpu.memory_space<vmem>>, vector<16x128xf32>
    tpu.vector_store %arg5[%c0_5, %c0_6], %5 {strides = array<i32>} : memref<16x128xf32, #tpu.memory_space<vmem>>, vector<16x128xf32>,
    return
  }
  func.func @transform_0(%arg0: i32, %arg1: i32) -> (i32, i32) {
    %c0_i32 = arith.constant 0 : i32
    %c0_i32_0 = arith.constant 0 : i32
    return %arg1, %c0_i32 : i32, i32
  }
  func.func @transform_1(%arg0: i32, %arg1: i32) -> (i32, i32) {
    %c0_i32 = arith.constant 0 : i32
    %c0_i32_0 = arith.constant 0 : i32
    return %c0_i32, %arg0 : i32, i32
  }
  func.func @transform_2(%arg0: i32, %arg1: i32) -> (i32, i32) {
    %c0_i32 = arith.constant 0 : i32
    %c0_i32_0 = arith.constant 0 : i32
    return %c0_i32, %arg0 : i32, i32
  }
  func.func @transform_3(%arg0: i32, %arg1: i32) -> (i32, i32) {
    %c0_i32 = arith.constant 0 : i32
    return %arg1, %arg0 : i32, i32
  }
}

module attributes {stable_mosaic.version = 11 : i64} {
  func.func @_lstm_recurrent_kernel(%arg0: i32, %arg1: i32, %arg2: memref<8x2x32xbf16, #tpu.memory_space<vmem>>, %arg3: memref<32x128xbf16, #tpu.memory_space<vmem>>, %arg4: memref<32x128xbf16, #tpu.memory_space<vmem>>, %arg5: memref<1x128xf32, #tpu.memory_space<vmem>>, %arg6: memref<8x2x32xbf16, #tpu.memory_space<vmem>>, %arg7: memref<2x32xf32, #tpu.memory_space<vmem>>, %arg8: memref<2x32xf32, #tpu.memory_space<vmem>>) attributes {dimension_semantics = [#tpu.dimension_semantics<parallel>, #tpu.dimension_semantics<arbitrary>], iteration_bounds = array<i64: 1, 1>, scalar_prefetch = 0 : i64, scratch_operands = 2 : i64, tpu.core_type = #tpu.core_type<tc>, window_params = [{transform_indices = @transform_0, window_bounds = array<i64: 8, 2, 32>}, {pipeline_mode = #tpu.pipeline_mode<synchronous>, transform_indices = @transform_1, window_bounds = array<i64: 32, 128>}, {pipeline_mode = #tpu.pipeline_mode<synchronous>, transform_indices = @transform_2, window_bounds = array<i64: 32, 128>}, {pipeline_mode = #tpu.pipeline_mode<synchronous>, transform_indices = @transform_3, window_bounds = array<i64: 1, 128>}, {transform_indices = @transform_4, window_bounds = array<i64: 8, 2, 32>}]} {
    %c0_i32 = arith.constant 0 : i32
    %0 = arith.cmpi eq, %arg1, %c0_i32 : i32
    %1 = arith.extui %0 : i1 to i32
    %c0_i32_0 = arith.constant 0 : i32
    %2 = arith.cmpi ne, %1, %c0_i32_0 : i32
    scf.if %2 {
      %cst_78 = arith.constant 0.000000e+00 : f32
      %228 = vector.broadcast %cst_78 : f32 to vector<2x32xf32>
      %c0_79 = arith.constant 0 : index
      %c0_80 = arith.constant 0 : index
      %229 = vector.load %arg7[%c0_79, %c0_80] : memref<2x32xf32, #tpu.memory_space<vmem>>, vector<2x32xf32>
      tpu.vector_store %arg7[%c0_79, %c0_80], %228 {strides = array<i32>} : memref<2x32xf32, #tpu.memory_space<vmem>>, vector<2x32xf32>,
      %cst_81 = arith.constant 0.000000e+00 : f32
      %230 = vector.broadcast %cst_81 : f32 to vector<2x32xf32>
      %c0_82 = arith.constant 0 : index
      %c0_83 = arith.constant 0 : index
      %231 = vector.load %arg8[%c0_82, %c0_83] : memref<2x32xf32, #tpu.memory_space<vmem>>, vector<2x32xf32>
      tpu.vector_store %arg8[%c0_82, %c0_83], %230 {strides = array<i32>} : memref<2x32xf32, #tpu.memory_space<vmem>>, vector<2x32xf32>,
    } else {
    }
    %c0 = arith.constant 0 : index
    %c0_1 = arith.constant 0 : index
    %3 = vector.load %arg3[%c0, %c0_1] : memref<32x128xbf16, #tpu.memory_space<vmem>>, vector<32x128xbf16>
    %c0_2 = arith.constant 0 : index
    %c0_3 = arith.constant 0 : index
    %4 = vector.load %arg4[%c0_2, %c0_3] : memref<32x128xbf16, #tpu.memory_space<vmem>>, vector<32x128xbf16>
    %c0_4 = arith.constant 0 : index
    %c0_5 = arith.constant 0 : index
    %5 = vector.load %arg5[%c0_4, %c0_5] : memref<1x128xf32, #tpu.memory_space<vmem>>, vector<1x128xf32>
    %6 = vector.shape_cast %5 : vector<1x128xf32> to vector<1x128xf32>
    %7 = vector.broadcast %6 : vector<1x128xf32> to vector<2x128xf32>
    %c0_6 = arith.constant 0 : index
    %c0_7 = arith.constant 0 : index
    %8 = vector.load %arg7[%c0_6, %c0_7] : memref<2x32xf32, #tpu.memory_space<vmem>>, vector<2x32xf32>
    %c0_8 = arith.constant 0 : index
    %c0_9 = arith.constant 0 : index
    %9 = vector.load %arg8[%c0_8, %c0_9] : memref<2x32xf32, #tpu.memory_space<vmem>>, vector<2x32xf32>
    %c0_10 = arith.constant 0 : index
    %c0_11 = arith.constant 0 : index
    %c0_12 = arith.constant 0 : index
    %10 = vector.load %arg2[%c0_10, %c0_11, %c0_12] : memref<8x2x32xbf16, #tpu.memory_space<vmem>>, vector<1x2x32xbf16>
    %11 = vector.shape_cast %10 : vector<1x2x32xbf16> to vector<2x32xbf16>
    %cst = arith.constant dense<0.000000e+00> : vector<2x128xf32>
    %12 = tpu.matmul %11, %3, %cst {dimension_numbers = #tpu.dot_dimension_numbers<[1], [0], [0], [1], [0, 0, 1, 1], [], []>} : vector<2x32xbf16>, vector<32x128xbf16>, vector<2x128xf32> -> vector<2x128xf32>
    %13 = arith.addf %12, %7 : vector<2x128xf32>
    %14 = arith.truncf %8 : vector<2x32xf32> to vector<2x32xbf16>
    %cst_13 = arith.constant dense<0.000000e+00> : vector<2x128xf32>
    %15 = tpu.matmul %14, %4, %cst_13 {dimension_numbers = #tpu.dot_dimension_numbers<[1], [0], [0], [1], [0, 0, 1, 1], [], []>} : vector<2x32xbf16>, vector<32x128xbf16>, vector<2x128xf32> -> vector<2x128xf32>
    %16 = arith.addf %13, %15 : vector<2x128xf32>
    %17 = vector.extract_strided_slice %16 {offsets = [0, 0], sizes = [2, 96], strides = [1, 1]} : vector<2x128xf32> to vector<2x96xf32>
    %18 = arith.negf %17 : vector<2x96xf32>
    %19 = math.exp %18 : vector<2x96xf32>
    %cst_14 = arith.constant 1.000000e+00 : f32
    %20 = vector.broadcast %cst_14 : f32 to vector<2x96xf32>
    %21 = arith.addf %20, %19 : vector<2x96xf32>
    %22 = arith.divf %20, %21 : vector<2x96xf32>
    %23 = vector.extract_strided_slice %22 {offsets = [0, 0], sizes = [2, 32], strides = [1, 1]} : vector<2x96xf32> to vector<2x32xf32>
    %24 = vector.extract_strided_slice %22 {offsets = [0, 32], sizes = [2, 32], strides = [1, 1]} : vector<2x96xf32> to vector<2x32xf32>
    %25 = vector.extract_strided_slice %22 {offsets = [0, 64], sizes = [2, 32], strides = [1, 1]} : vector<2x96xf32> to vector<2x32xf32>
    %26 = vector.extract_strided_slice %16 {offsets = [0, 96], sizes = [2, 32], strides = [1, 1]} : vector<2x128xf32> to vector<2x32xf32>
    %27 = math.tanh %26 : vector<2x32xf32>
    %28 = arith.mulf %24, %9 : vector<2x32xf32>
    %29 = arith.mulf %23, %27 : vector<2x32xf32>
    %30 = arith.addf %28, %29 : vector<2x32xf32>
    %31 = math.tanh %30 : vector<2x32xf32>
    %32 = arith.mulf %25, %31 : vector<2x32xf32>
    %33 = arith.truncf %32 : vector<2x32xf32> to vector<2x32xbf16>
    %c0_15 = arith.constant 0 : index
    %c0_16 = arith.constant 0 : index
    %c0_17 = arith.constant 0 : index
    %34 = vector.load %arg6[%c0_15, %c0_16, %c0_17] : memref<8x2x32xbf16, #tpu.memory_space<vmem>>, vector<1x2x32xbf16>
    %35 = vector.shape_cast %34 : vector<1x2x32xbf16> to vector<2x32xbf16>
    %36 = vector.shape_cast %33 : vector<2x32xbf16> to vector<1x2x32xbf16>
    tpu.vector_store %arg6[%c0_15, %c0_16, %c0_17], %36 {strides = array<i32>} : memref<8x2x32xbf16, #tpu.memory_space<vmem>>, vector<1x2x32xbf16>,
    %c1 = arith.constant 1 : index
    %c0_18 = arith.constant 0 : index
    %c0_19 = arith.constant 0 : index
    %37 = vector.load %arg2[%c1, %c0_18, %c0_19] : memref<8x2x32xbf16, #tpu.memory_space<vmem>>, vector<1x2x32xbf16>
    %38 = vector.shape_cast %37 : vector<1x2x32xbf16> to vector<2x32xbf16>
    %cst_20 = arith.constant dense<0.000000e+00> : vector<2x128xf32>
    %39 = tpu.matmul %38, %3, %cst_20 {dimension_numbers = #tpu.dot_dimension_numbers<[1], [0], [0], [1], [0, 0, 1, 1], [], []>} : vector<2x32xbf16>, vector<32x128xbf16>, vector<2x128xf32> -> vector<2x128xf32>
    %40 = arith.addf %39, %7 : vector<2x128xf32>
    %41 = arith.truncf %32 : vector<2x32xf32> to vector<2x32xbf16>
    %cst_21 = arith.constant dense<0.000000e+00> : vector<2x128xf32>
    %42 = tpu.matmul %41, %4, %cst_21 {dimension_numbers = #tpu.dot_dimension_numbers<[1], [0], [0], [1], [0, 0, 1, 1], [], []>} : vector<2x32xbf16>, vector<32x128xbf16>, vector<2x128xf32> -> vector<2x128xf32>
    %43 = arith.addf %40, %42 : vector<2x128xf32>
    %44 = vector.extract_strided_slice %43 {offsets = [0, 0], sizes = [2, 96], strides = [1, 1]} : vector<2x128xf32> to vector<2x96xf32>
    %45 = arith.negf %44 : vector<2x96xf32>
    %46 = math.exp %45 : vector<2x96xf32>
    %cst_22 = arith.constant 1.000000e+00 : f32
    %47 = vector.broadcast %cst_22 : f32 to vector<2x96xf32>
    %48 = arith.addf %47, %46 : vector<2x96xf32>
    %49 = arith.divf %47, %48 : vector<2x96xf32>
    %50 = vector.extract_strided_slice %49 {offsets = [0, 0], sizes = [2, 32], strides = [1, 1]} : vector<2x96xf32> to vector<2x32xf32>
    %51 = vector.extract_strided_slice %49 {offsets = [0, 32], sizes = [2, 32], strides = [1, 1]} : vector<2x96xf32> to vector<2x32xf32>
    %52 = vector.extract_strided_slice %49 {offsets = [0, 64], sizes = [2, 32], strides = [1, 1]} : vector<2x96xf32> to vector<2x32xf32>
    %53 = vector.extract_strided_slice %43 {offsets = [0, 96], sizes = [2, 32], strides = [1, 1]} : vector<2x128xf32> to vector<2x32xf32>
    %54 = math.tanh %53 : vector<2x32xf32>
    %55 = arith.mulf %51, %30 : vector<2x32xf32>
    %56 = arith.mulf %50, %54 : vector<2x32xf32>
    %57 = arith.addf %55, %56 : vector<2x32xf32>
    %58 = math.tanh %57 : vector<2x32xf32>
    %59 = arith.mulf %52, %58 : vector<2x32xf32>
    %60 = arith.truncf %59 : vector<2x32xf32> to vector<2x32xbf16>
    %c1_23 = arith.constant 1 : index
    %c0_24 = arith.constant 0 : index
    %c0_25 = arith.constant 0 : index
    %61 = vector.load %arg6[%c1_23, %c0_24, %c0_25] : memref<8x2x32xbf16, #tpu.memory_space<vmem>>, vector<1x2x32xbf16>
    %62 = vector.shape_cast %61 : vector<1x2x32xbf16> to vector<2x32xbf16>
    %63 = vector.shape_cast %60 : vector<2x32xbf16> to vector<1x2x32xbf16>
    tpu.vector_store %arg6[%c1_23, %c0_24, %c0_25], %63 {strides = array<i32>} : memref<8x2x32xbf16, #tpu.memory_space<vmem>>, vector<1x2x32xbf16>,
    %c2 = arith.constant 2 : index
    %c0_26 = arith.constant 0 : index
    %c0_27 = arith.constant 0 : index
    %64 = vector.load %arg2[%c2, %c0_26, %c0_27] : memref<8x2x32xbf16, #tpu.memory_space<vmem>>, vector<1x2x32xbf16>
    %65 = vector.shape_cast %64 : vector<1x2x32xbf16> to vector<2x32xbf16>
    %cst_28 = arith.constant dense<0.000000e+00> : vector<2x128xf32>
    %66 = tpu.matmul %65, %3, %cst_28 {dimension_numbers = #tpu.dot_dimension_numbers<[1], [0], [0], [1], [0, 0, 1, 1], [], []>} : vector<2x32xbf16>, vector<32x128xbf16>, vector<2x128xf32> -> vector<2x128xf32>
    %67 = arith.addf %66, %7 : vector<2x128xf32>
    %68 = arith.truncf %59 : vector<2x32xf32> to vector<2x32xbf16>
    %cst_29 = arith.constant dense<0.000000e+00> : vector<2x128xf32>
    %69 = tpu.matmul %68, %4, %cst_29 {dimension_numbers = #tpu.dot_dimension_numbers<[1], [0], [0], [1], [0, 0, 1, 1], [], []>} : vector<2x32xbf16>, vector<32x128xbf16>, vector<2x128xf32> -> vector<2x128xf32>
    %70 = arith.addf %67, %69 : vector<2x128xf32>
    %71 = vector.extract_strided_slice %70 {offsets = [0, 0], sizes = [2, 96], strides = [1, 1]} : vector<2x128xf32> to vector<2x96xf32>
    %72 = arith.negf %71 : vector<2x96xf32>
    %73 = math.exp %72 : vector<2x96xf32>
    %cst_30 = arith.constant 1.000000e+00 : f32
    %74 = vector.broadcast %cst_30 : f32 to vector<2x96xf32>
    %75 = arith.addf %74, %73 : vector<2x96xf32>
    %76 = arith.divf %74, %75 : vector<2x96xf32>
    %77 = vector.extract_strided_slice %76 {offsets = [0, 0], sizes = [2, 32], strides = [1, 1]} : vector<2x96xf32> to vector<2x32xf32>
    %78 = vector.extract_strided_slice %76 {offsets = [0, 32], sizes = [2, 32], strides = [1, 1]} : vector<2x96xf32> to vector<2x32xf32>
    %79 = vector.extract_strided_slice %76 {offsets = [0, 64], sizes = [2, 32], strides = [1, 1]} : vector<2x96xf32> to vector<2x32xf32>
    %80 = vector.extract_strided_slice %70 {offsets = [0, 96], sizes = [2, 32], strides = [1, 1]} : vector<2x128xf32> to vector<2x32xf32>
    %81 = math.tanh %80 : vector<2x32xf32>
    %82 = arith.mulf %78, %57 : vector<2x32xf32>
    %83 = arith.mulf %77, %81 : vector<2x32xf32>
    %84 = arith.addf %82, %83 : vector<2x32xf32>
    %85 = math.tanh %84 : vector<2x32xf32>
    %86 = arith.mulf %79, %85 : vector<2x32xf32>
    %87 = arith.truncf %86 : vector<2x32xf32> to vector<2x32xbf16>
    %c2_31 = arith.constant 2 : index
    %c0_32 = arith.constant 0 : index
    %c0_33 = arith.constant 0 : index
    %88 = vector.load %arg6[%c2_31, %c0_32, %c0_33] : memref<8x2x32xbf16, #tpu.memory_space<vmem>>, vector<1x2x32xbf16>
    %89 = vector.shape_cast %88 : vector<1x2x32xbf16> to vector<2x32xbf16>
    %90 = vector.shape_cast %87 : vector<2x32xbf16> to vector<1x2x32xbf16>
    tpu.vector_store %arg6[%c2_31, %c0_32, %c0_33], %90 {strides = array<i32>} : memref<8x2x32xbf16, #tpu.memory_space<vmem>>, vector<1x2x32xbf16>,
    %c3 = arith.constant 3 : index
    %c0_34 = arith.constant 0 : index
    %c0_35 = arith.constant 0 : index
    %91 = vector.load %arg2[%c3, %c0_34, %c0_35] : memref<8x2x32xbf16, #tpu.memory_space<vmem>>, vector<1x2x32xbf16>
    %92 = vector.shape_cast %91 : vector<1x2x32xbf16> to vector<2x32xbf16>
    %cst_36 = arith.constant dense<0.000000e+00> : vector<2x128xf32>
    %93 = tpu.matmul %92, %3, %cst_36 {dimension_numbers = #tpu.dot_dimension_numbers<[1], [0], [0], [1], [0, 0, 1, 1], [], []>} : vector<2x32xbf16>, vector<32x128xbf16>, vector<2x128xf32> -> vector<2x128xf32>
    %94 = arith.addf %93, %7 : vector<2x128xf32>
    %95 = arith.truncf %86 : vector<2x32xf32> to vector<2x32xbf16>
    %cst_37 = arith.constant dense<0.000000e+00> : vector<2x128xf32>
    %96 = tpu.matmul %95, %4, %cst_37 {dimension_numbers = #tpu.dot_dimension_numbers<[1], [0], [0], [1], [0, 0, 1, 1], [], []>} : vector<2x32xbf16>, vector<32x128xbf16>, vector<2x128xf32> -> vector<2x128xf32>
    %97 = arith.addf %94, %96 : vector<2x128xf32>
    %98 = vector.extract_strided_slice %97 {offsets = [0, 0], sizes = [2, 96], strides = [1, 1]} : vector<2x128xf32> to vector<2x96xf32>
    %99 = arith.negf %98 : vector<2x96xf32>
    %100 = math.exp %99 : vector<2x96xf32>
    %cst_38 = arith.constant 1.000000e+00 : f32
    %101 = vector.broadcast %cst_38 : f32 to vector<2x96xf32>
    %102 = arith.addf %101, %100 : vector<2x96xf32>
    %103 = arith.divf %101, %102 : vector<2x96xf32>
    %104 = vector.extract_strided_slice %103 {offsets = [0, 0], sizes = [2, 32], strides = [1, 1]} : vector<2x96xf32> to vector<2x32xf32>
    %105 = vector.extract_strided_slice %103 {offsets = [0, 32], sizes = [2, 32], strides = [1, 1]} : vector<2x96xf32> to vector<2x32xf32>
    %106 = vector.extract_strided_slice %103 {offsets = [0, 64], sizes = [2, 32], strides = [1, 1]} : vector<2x96xf32> to vector<2x32xf32>
    %107 = vector.extract_strided_slice %97 {offsets = [0, 96], sizes = [2, 32], strides = [1, 1]} : vector<2x128xf32> to vector<2x32xf32>
    %108 = math.tanh %107 : vector<2x32xf32>
    %109 = arith.mulf %105, %84 : vector<2x32xf32>
    %110 = arith.mulf %104, %108 : vector<2x32xf32>
    %111 = arith.addf %109, %110 : vector<2x32xf32>
    %112 = math.tanh %111 : vector<2x32xf32>
    %113 = arith.mulf %106, %112 : vector<2x32xf32>
    %114 = arith.truncf %113 : vector<2x32xf32> to vector<2x32xbf16>
    %c3_39 = arith.constant 3 : index
    %c0_40 = arith.constant 0 : index
    %c0_41 = arith.constant 0 : index
    %115 = vector.load %arg6[%c3_39, %c0_40, %c0_41] : memref<8x2x32xbf16, #tpu.memory_space<vmem>>, vector<1x2x32xbf16>
    %116 = vector.shape_cast %115 : vector<1x2x32xbf16> to vector<2x32xbf16>
    %117 = vector.shape_cast %114 : vector<2x32xbf16> to vector<1x2x32xbf16>
    tpu.vector_store %arg6[%c3_39, %c0_40, %c0_41], %117 {strides = array<i32>} : memref<8x2x32xbf16, #tpu.memory_space<vmem>>, vector<1x2x32xbf16>,
    %c4 = arith.constant 4 : index
    %c0_42 = arith.constant 0 : index
    %c0_43 = arith.constant 0 : index
    %118 = vector.load %arg2[%c4, %c0_42, %c0_43] : memref<8x2x32xbf16, #tpu.memory_space<vmem>>, vector<1x2x32xbf16>
    %119 = vector.shape_cast %118 : vector<1x2x32xbf16> to vector<2x32xbf16>
    %cst_44 = arith.constant dense<0.000000e+00> : vector<2x128xf32>
    %120 = tpu.matmul %119, %3, %cst_44 {dimension_numbers = #tpu.dot_dimension_numbers<[1], [0], [0], [1], [0, 0, 1, 1], [], []>} : vector<2x32xbf16>, vector<32x128xbf16>, vector<2x128xf32> -> vector<2x128xf32>
    %121 = arith.addf %120, %7 : vector<2x128xf32>
    %122 = arith.truncf %113 : vector<2x32xf32> to vector<2x32xbf16>
    %cst_45 = arith.constant dense<0.000000e+00> : vector<2x128xf32>
    %123 = tpu.matmul %122, %4, %cst_45 {dimension_numbers = #tpu.dot_dimension_numbers<[1], [0], [0], [1], [0, 0, 1, 1], [], []>} : vector<2x32xbf16>, vector<32x128xbf16>, vector<2x128xf32> -> vector<2x128xf32>
    %124 = arith.addf %121, %123 : vector<2x128xf32>
    %125 = vector.extract_strided_slice %124 {offsets = [0, 0], sizes = [2, 96], strides = [1, 1]} : vector<2x128xf32> to vector<2x96xf32>
    %126 = arith.negf %125 : vector<2x96xf32>
    %127 = math.exp %126 : vector<2x96xf32>
    %cst_46 = arith.constant 1.000000e+00 : f32
    %128 = vector.broadcast %cst_46 : f32 to vector<2x96xf32>
    %129 = arith.addf %128, %127 : vector<2x96xf32>
    %130 = arith.divf %128, %129 : vector<2x96xf32>
    %131 = vector.extract_strided_slice %130 {offsets = [0, 0], sizes = [2, 32], strides = [1, 1]} : vector<2x96xf32> to vector<2x32xf32>
    %132 = vector.extract_strided_slice %130 {offsets = [0, 32], sizes = [2, 32], strides = [1, 1]} : vector<2x96xf32> to vector<2x32xf32>
    %133 = vector.extract_strided_slice %130 {offsets = [0, 64], sizes = [2, 32], strides = [1, 1]} : vector<2x96xf32> to vector<2x32xf32>
    %134 = vector.extract_strided_slice %124 {offsets = [0, 96], sizes = [2, 32], strides = [1, 1]} : vector<2x128xf32> to vector<2x32xf32>
    %135 = math.tanh %134 : vector<2x32xf32>
    %136 = arith.mulf %132, %111 : vector<2x32xf32>
    %137 = arith.mulf %131, %135 : vector<2x32xf32>
    %138 = arith.addf %136, %137 : vector<2x32xf32>
    %139 = math.tanh %138 : vector<2x32xf32>
    %140 = arith.mulf %133, %139 : vector<2x32xf32>
    %141 = arith.truncf %140 : vector<2x32xf32> to vector<2x32xbf16>
    %c4_47 = arith.constant 4 : index
    %c0_48 = arith.constant 0 : index
    %c0_49 = arith.constant 0 : index
    %142 = vector.load %arg6[%c4_47, %c0_48, %c0_49] : memref<8x2x32xbf16, #tpu.memory_space<vmem>>, vector<1x2x32xbf16>
    %143 = vector.shape_cast %142 : vector<1x2x32xbf16> to vector<2x32xbf16>
    %144 = vector.shape_cast %141 : vector<2x32xbf16> to vector<1x2x32xbf16>
    tpu.vector_store %arg6[%c4_47, %c0_48, %c0_49], %144 {strides = array<i32>} : memref<8x2x32xbf16, #tpu.memory_space<vmem>>, vector<1x2x32xbf16>,
    %c5 = arith.constant 5 : index
    %c0_50 = arith.constant 0 : index
    %c0_51 = arith.constant 0 : index
    %145 = vector.load %arg2[%c5, %c0_50, %c0_51] : memref<8x2x32xbf16, #tpu.memory_space<vmem>>, vector<1x2x32xbf16>
    %146 = vector.shape_cast %145 : vector<1x2x32xbf16> to vector<2x32xbf16>
    %cst_52 = arith.constant dense<0.000000e+00> : vector<2x128xf32>
    %147 = tpu.matmul %146, %3, %cst_52 {dimension_numbers = #tpu.dot_dimension_numbers<[1], [0], [0], [1], [0, 0, 1, 1], [], []>} : vector<2x32xbf16>, vector<32x128xbf16>, vector<2x128xf32> -> vector<2x128xf32>
    %148 = arith.addf %147, %7 : vector<2x128xf32>
    %149 = arith.truncf %140 : vector<2x32xf32> to vector<2x32xbf16>
    %cst_53 = arith.constant dense<0.000000e+00> : vector<2x128xf32>
    %150 = tpu.matmul %149, %4, %cst_53 {dimension_numbers = #tpu.dot_dimension_numbers<[1], [0], [0], [1], [0, 0, 1, 1], [], []>} : vector<2x32xbf16>, vector<32x128xbf16>, vector<2x128xf32> -> vector<2x128xf32>
    %151 = arith.addf %148, %150 : vector<2x128xf32>
    %152 = vector.extract_strided_slice %151 {offsets = [0, 0], sizes = [2, 96], strides = [1, 1]} : vector<2x128xf32> to vector<2x96xf32>
    %153 = arith.negf %152 : vector<2x96xf32>
    %154 = math.exp %153 : vector<2x96xf32>
    %cst_54 = arith.constant 1.000000e+00 : f32
    %155 = vector.broadcast %cst_54 : f32 to vector<2x96xf32>
    %156 = arith.addf %155, %154 : vector<2x96xf32>
    %157 = arith.divf %155, %156 : vector<2x96xf32>
    %158 = vector.extract_strided_slice %157 {offsets = [0, 0], sizes = [2, 32], strides = [1, 1]} : vector<2x96xf32> to vector<2x32xf32>
    %159 = vector.extract_strided_slice %157 {offsets = [0, 32], sizes = [2, 32], strides = [1, 1]} : vector<2x96xf32> to vector<2x32xf32>
    %160 = vector.extract_strided_slice %157 {offsets = [0, 64], sizes = [2, 32], strides = [1, 1]} : vector<2x96xf32> to vector<2x32xf32>
    %161 = vector.extract_strided_slice %151 {offsets = [0, 96], sizes = [2, 32], strides = [1, 1]} : vector<2x128xf32> to vector<2x32xf32>
    %162 = math.tanh %161 : vector<2x32xf32>
    %163 = arith.mulf %159, %138 : vector<2x32xf32>
    %164 = arith.mulf %158, %162 : vector<2x32xf32>
    %165 = arith.addf %163, %164 : vector<2x32xf32>
    %166 = math.tanh %165 : vector<2x32xf32>
    %167 = arith.mulf %160, %166 : vector<2x32xf32>
    %168 = arith.truncf %167 : vector<2x32xf32> to vector<2x32xbf16>
    %c5_55 = arith.constant 5 : index
    %c0_56 = arith.constant 0 : index
    %c0_57 = arith.constant 0 : index
    %169 = vector.load %arg6[%c5_55, %c0_56, %c0_57] : memref<8x2x32xbf16, #tpu.memory_space<vmem>>, vector<1x2x32xbf16>
    %170 = vector.shape_cast %169 : vector<1x2x32xbf16> to vector<2x32xbf16>
    %171 = vector.shape_cast %168 : vector<2x32xbf16> to vector<1x2x32xbf16>
    tpu.vector_store %arg6[%c5_55, %c0_56, %c0_57], %171 {strides = array<i32>} : memref<8x2x32xbf16, #tpu.memory_space<vmem>>, vector<1x2x32xbf16>,
    %c6 = arith.constant 6 : index
    %c0_58 = arith.constant 0 : index
    %c0_59 = arith.constant 0 : index
    %172 = vector.load %arg2[%c6, %c0_58, %c0_59] : memref<8x2x32xbf16, #tpu.memory_space<vmem>>, vector<1x2x32xbf16>
    %173 = vector.shape_cast %172 : vector<1x2x32xbf16> to vector<2x32xbf16>
    %cst_60 = arith.constant dense<0.000000e+00> : vector<2x128xf32>
    %174 = tpu.matmul %173, %3, %cst_60 {dimension_numbers = #tpu.dot_dimension_numbers<[1], [0], [0], [1], [0, 0, 1, 1], [], []>} : vector<2x32xbf16>, vector<32x128xbf16>, vector<2x128xf32> -> vector<2x128xf32>
    %175 = arith.addf %174, %7 : vector<2x128xf32>
    %176 = arith.truncf %167 : vector<2x32xf32> to vector<2x32xbf16>
    %cst_61 = arith.constant dense<0.000000e+00> : vector<2x128xf32>
    %177 = tpu.matmul %176, %4, %cst_61 {dimension_numbers = #tpu.dot_dimension_numbers<[1], [0], [0], [1], [0, 0, 1, 1], [], []>} : vector<2x32xbf16>, vector<32x128xbf16>, vector<2x128xf32> -> vector<2x128xf32>
    %178 = arith.addf %175, %177 : vector<2x128xf32>
    %179 = vector.extract_strided_slice %178 {offsets = [0, 0], sizes = [2, 96], strides = [1, 1]} : vector<2x128xf32> to vector<2x96xf32>
    %180 = arith.negf %179 : vector<2x96xf32>
    %181 = math.exp %180 : vector<2x96xf32>
    %cst_62 = arith.constant 1.000000e+00 : f32
    %182 = vector.broadcast %cst_62 : f32 to vector<2x96xf32>
    %183 = arith.addf %182, %181 : vector<2x96xf32>
    %184 = arith.divf %182, %183 : vector<2x96xf32>
    %185 = vector.extract_strided_slice %184 {offsets = [0, 0], sizes = [2, 32], strides = [1, 1]} : vector<2x96xf32> to vector<2x32xf32>
    %186 = vector.extract_strided_slice %184 {offsets = [0, 32], sizes = [2, 32], strides = [1, 1]} : vector<2x96xf32> to vector<2x32xf32>
    %187 = vector.extract_strided_slice %184 {offsets = [0, 64], sizes = [2, 32], strides = [1, 1]} : vector<2x96xf32> to vector<2x32xf32>
    %188 = vector.extract_strided_slice %178 {offsets = [0, 96], sizes = [2, 32], strides = [1, 1]} : vector<2x128xf32> to vector<2x32xf32>
    %189 = math.tanh %188 : vector<2x32xf32>
    %190 = arith.mulf %186, %165 : vector<2x32xf32>
    %191 = arith.mulf %185, %189 : vector<2x32xf32>
    %192 = arith.addf %190, %191 : vector<2x32xf32>
    %193 = math.tanh %192 : vector<2x32xf32>
    %194 = arith.mulf %187, %193 : vector<2x32xf32>
    %195 = arith.truncf %194 : vector<2x32xf32> to vector<2x32xbf16>
    %c6_63 = arith.constant 6 : index
    %c0_64 = arith.constant 0 : index
    %c0_65 = arith.constant 0 : index
    %196 = vector.load %arg6[%c6_63, %c0_64, %c0_65] : memref<8x2x32xbf16, #tpu.memory_space<vmem>>, vector<1x2x32xbf16>
    %197 = vector.shape_cast %196 : vector<1x2x32xbf16> to vector<2x32xbf16>
    %198 = vector.shape_cast %195 : vector<2x32xbf16> to vector<1x2x32xbf16>
    tpu.vector_store %arg6[%c6_63, %c0_64, %c0_65], %198 {strides = array<i32>} : memref<8x2x32xbf16, #tpu.memory_space<vmem>>, vector<1x2x32xbf16>,
    %c7 = arith.constant 7 : index
    %c0_66 = arith.constant 0 : index
    %c0_67 = arith.constant 0 : index
    %199 = vector.load %arg2[%c7, %c0_66, %c0_67] : memref<8x2x32xbf16, #tpu.memory_space<vmem>>, vector<1x2x32xbf16>
    %200 = vector.shape_cast %199 : vector<1x2x32xbf16> to vector<2x32xbf16>
    %cst_68 = arith.constant dense<0.000000e+00> : vector<2x128xf32>
    %201 = tpu.matmul %200, %3, %cst_68 {dimension_numbers = #tpu.dot_dimension_numbers<[1], [0], [0], [1], [0, 0, 1, 1], [], []>} : vector<2x32xbf16>, vector<32x128xbf16>, vector<2x128xf32> -> vector<2x128xf32>
    %202 = arith.addf %201, %7 : vector<2x128xf32>
    %203 = arith.truncf %194 : vector<2x32xf32> to vector<2x32xbf16>
    %cst_69 = arith.constant dense<0.000000e+00> : vector<2x128xf32>
    %204 = tpu.matmul %203, %4, %cst_69 {dimension_numbers = #tpu.dot_dimension_numbers<[1], [0], [0], [1], [0, 0, 1, 1], [], []>} : vector<2x32xbf16>, vector<32x128xbf16>, vector<2x128xf32> -> vector<2x128xf32>
    %205 = arith.addf %202, %204 : vector<2x128xf32>
    %206 = vector.extract_strided_slice %205 {offsets = [0, 0], sizes = [2, 96], strides = [1, 1]} : vector<2x128xf32> to vector<2x96xf32>
    %207 = arith.negf %206 : vector<2x96xf32>
    %208 = math.exp %207 : vector<2x96xf32>
    %cst_70 = arith.constant 1.000000e+00 : f32
    %209 = vector.broadcast %cst_70 : f32 to vector<2x96xf32>
    %210 = arith.addf %209, %208 : vector<2x96xf32>
    %211 = arith.divf %209, %210 : vector<2x96xf32>
    %212 = vector.extract_strided_slice %211 {offsets = [0, 0], sizes = [2, 32], strides = [1, 1]} : vector<2x96xf32> to vector<2x32xf32>
    %213 = vector.extract_strided_slice %211 {offsets = [0, 32], sizes = [2, 32], strides = [1, 1]} : vector<2x96xf32> to vector<2x32xf32>
    %214 = vector.extract_strided_slice %211 {offsets = [0, 64], sizes = [2, 32], strides = [1, 1]} : vector<2x96xf32> to vector<2x32xf32>
    %215 = vector.extract_strided_slice %205 {offsets = [0, 96], sizes = [2, 32], strides = [1, 1]} : vector<2x128xf32> to vector<2x32xf32>
    %216 = math.tanh %215 : vector<2x32xf32>
    %217 = arith.mulf %213, %192 : vector<2x32xf32>
    %218 = arith.mulf %212, %216 : vector<2x32xf32>
    %219 = arith.addf %217, %218 : vector<2x32xf32>
    %220 = math.tanh %219 : vector<2x32xf32>
    %221 = arith.mulf %214, %220 : vector<2x32xf32>
    %222 = arith.truncf %221 : vector<2x32xf32> to vector<2x32xbf16>
    %c7_71 = arith.constant 7 : index
    %c0_72 = arith.constant 0 : index
    %c0_73 = arith.constant 0 : index
    %223 = vector.load %arg6[%c7_71, %c0_72, %c0_73] : memref<8x2x32xbf16, #tpu.memory_space<vmem>>, vector<1x2x32xbf16>
    %224 = vector.shape_cast %223 : vector<1x2x32xbf16> to vector<2x32xbf16>
    %225 = vector.shape_cast %222 : vector<2x32xbf16> to vector<1x2x32xbf16>
    tpu.vector_store %arg6[%c7_71, %c0_72, %c0_73], %225 {strides = array<i32>} : memref<8x2x32xbf16, #tpu.memory_space<vmem>>, vector<1x2x32xbf16>,
    %c0_74 = arith.constant 0 : index
    %c0_75 = arith.constant 0 : index
    %226 = vector.load %arg7[%c0_74, %c0_75] : memref<2x32xf32, #tpu.memory_space<vmem>>, vector<2x32xf32>
    tpu.vector_store %arg7[%c0_74, %c0_75], %221 {strides = array<i32>} : memref<2x32xf32, #tpu.memory_space<vmem>>, vector<2x32xf32>,
    %c0_76 = arith.constant 0 : index
    %c0_77 = arith.constant 0 : index
    %227 = vector.load %arg8[%c0_76, %c0_77] : memref<2x32xf32, #tpu.memory_space<vmem>>, vector<2x32xf32>
    tpu.vector_store %arg8[%c0_76, %c0_77], %219 {strides = array<i32>} : memref<2x32xf32, #tpu.memory_space<vmem>>, vector<2x32xf32>,
    return
  }
  func.func @transform_0(%arg0: i32, %arg1: i32) -> (i32, i32, i32) {
    %c0_i32 = arith.constant 0 : i32
    %c0_i32_0 = arith.constant 0 : i32
    return %arg1, %arg0, %c0_i32 : i32, i32, i32
  }
  func.func @transform_1(%arg0: i32, %arg1: i32) -> (i32, i32) {
    %c0_i32 = arith.constant 0 : i32
    %c0_i32_0 = arith.constant 0 : i32
    %c0_i32_1 = arith.constant 0 : i32
    return %c0_i32, %c0_i32_0 : i32, i32
  }
  func.func @transform_2(%arg0: i32, %arg1: i32) -> (i32, i32) {
    %c0_i32 = arith.constant 0 : i32
    %c0_i32_0 = arith.constant 0 : i32
    %c0_i32_1 = arith.constant 0 : i32
    return %c0_i32, %c0_i32_0 : i32, i32
  }
  func.func @transform_3(%arg0: i32, %arg1: i32) -> (i32, i32) {
    %c0_i32 = arith.constant 0 : i32
    %c0_i32_0 = arith.constant 0 : i32
    %c0_i32_1 = arith.constant 0 : i32
    return %c0_i32, %c0_i32_0 : i32, i32
  }
  func.func @transform_4(%arg0: i32, %arg1: i32) -> (i32, i32, i32) {
    %c0_i32 = arith.constant 0 : i32
    %c0_i32_0 = arith.constant 0 : i32
    return %arg1, %arg0, %c0_i32 : i32, i32, i32
  }
}

</mosaic_0001>

<bundles_post_ra>
// kernel: recipe_lstm_forward.5
= control target key start
LH: loop header
LB: loop body
LE: loop exit
PB: predicated region body
PF: predicated region fallthrough
CT: control target
= control target key end

     0   :  { %v157_v1 = vmov 0.0   ;;  %vm158_vm0 = vmmov 0   ;;  %s206_s0 = inlined_call_operand.vmem [shape: bf16[16,32], index: 0, kind: input, shape index: {}]   ;;  %s207_s1 = inlined_call_operand.vmem [shape: bf16[32,128], index: 1, kind: input, shape index: {}]   ;;  %s208_s2 = inlined_call_operand.vmem [shape: f32[1,128], index: 2, kind: input, shape index: {}]   ;;  %s209_s3 = inlined_call_operand.hbm [shape: f32[16,128], index: 3, kind: output, shape index: {}]  }
   0x1   :  { %v130_v0 = vld [vmem:[%s207_s1] sm:$0xff]   ;;  %117 = vmatprep.subr.bf16.mxu0 %v157_v1  ;;  %v131_v2 = vld [vmem:[%s207_s1 + $0x8] sm:$0xff]   ;;  %121 = vmatprep.mubr.msk.bf16.mxu0 %vm158_vm0, %v157_v1 }
   0x2   :  { %118 = vmatpush3.bf16.msra.mxu0 %v130_v0 }
   0x3   :  { %119 = vmatprep.subr.bf16.mxu0 %v157_v1 }
   0x4   :  { %8 = vsyncpa [#allocation3], 0  ;;  %v132_v3 = vld [vmem:[%s206_s0] sm:$0xff]   ;;  %vm46_vm1 = vcmask 261120   ;;  %s159_s20 = smov [#allocation2]  }
   0x5   :  { %v109_v4 = vld [vmem:[%s208_s2] ss:$0 sm:$0xff]  ;;  %s98_s21 = sshll.u32 %s159_s20, 4  ;;  %s99_s21 = int_to_ptr.vmem [resolvable:$true] %s98_s21 }
   0x6   :  { %120 = vmatpush3.bf16.msra.mxu0 %v131_v2  ;;  %s133_s1 = scalar_lea.vmem %s99_s21, 256  ;;  %p138_p1 = scmp.lt.s32.totalorder %s99_s21, %s99_s21 }
   0x7   :  { %p134_p0 = scmp.ne.s32.totalorder %s99_s21, %s133_s1  ;;  %p139_p2 = scmp.lt.s32.totalorder %s133_s1, %s133_s1 }
   0x9   :  { %122 = vmatmul.mubr.msk.bf16.vlgmr.msra.gmra.mrb[0].mxu0 %vm46_vm1, %v132_v3  ;;  %p140_p3 = por %p139_p2, %p138_p1 }
   0xb   :  { %p141_p4 = pnand %p140_p3, %p134_p0 }
  0xdc   :  { %v84_v5 = vpop.f32.mrb[0].mxu0 }
  0xdd   :  { %v85_v6 = vadd.f32 %v109_v4, %v84_v5  ;;  %v123_v7 = vpop.f32.mrb[1].mxu0 }
  0xde   :  { %v87_v8 = vpop.f32.mrb[2].mxu0 }
  0xdf   :  { %91 = vst [vmem:[#allocation2] sm:$0xff] %v85_v6  ;;  %v88_v9 = vadd.f32 %v109_v4, %v87_v8  ;;  %v124_v10 = vpop.f32.mrb[3].mxu0 }
  0xe1   :  { %92 = vst [vmem:[#allocation2 + $0x8] sm:$0xff] %v88_v9 }
  0xe2   :  { %144 = shalt.err (!%p141_p4)
}
  0xe3   :  { %s145_s22 = scalar_lea.hbm %s209_s3, 256 }
  0xe4   :  { %p146_p5 = scmp.ne.s32.totalorder %s209_s3, %s145_s22  ;;  %p149_p6 = scmp.lt.u32.totalorder %s145_s22, %s209_s3 }
  0xe6   :  { %p151_p7 = pnand %p149_p6, %p146_p5 }
  0xe8   :  { %154 = shalt.err (!%p151_p7)
}
  0xe9   :  { %s160_s27 = smov 128   ;;  %s161_s28 = smov 8  }
  0xea   :  { %104 = dma.vmem_to_hbm [thread:$0]  %s99_s21, 256, %s209_s3, [#allocation3], %s160_s27, %s160_s27, %s161_s28  }
  0xeb   :  { %155 = dma.done.wait [#allocation3], 256  }
  0xec   :  { %156 = vsyncadd [#allocation3], 4294967040 }
  0xed   :  { %108 = vsyncpa [#allocation3], 1 }

// kernel: recipe_lstm_forward.3
= control target key start
LH: loop header
LB: loop body
LE: loop exit
PB: predicated region body
PF: predicated region fallthrough
CT: control target
= control target key end

     0   :  { %vm22_vm0 = vcmask 254976   ;;  %v1505_v0 = vmov 0.0   ;;  %vm1506_vm1 = vmmov 0   ;;  %vm55_vm2 = vcmask 261120   ;;  %s1507_s25 = smov 32   ;;  %s1508_s27 = smov 64   ;;  %s1808_s1 = inlined_call_operand.vmem [shape: bf16[32,128], index: 1, kind: input, shape index: {}]   ;;  %s1809_s2 = inlined_call_operand.vmem [shape: bf16[32,128], index: 2, kind: input, shape index: {}]   ;;  %s1810_s0 = inlined_call_operand.vmem [shape: bf16[8,2,32], index: 0, kind: input, shape index: {}]   ;;  %s1811_s3 = inlined_call_operand.vmem [shape: f32[1,128], index: 3, kind: input, shape index: {}]   ;;  %s1812_s4 = inlined_call_operand.vmem [shape: bf16[8,2,32], index: 4, kind: output, shape index: {}]  }
   0x1   :  { %1263 = vmatprep.subr.bf16.mxu0 %v1505_v0  ;;  %v1540_v1 = vld [vmem:[%s1808_s1] sm:$0xff]   ;;  %1267 = vmatprep.mubr.msk.bf16.mxu0 %vm1506_vm1, %v1505_v0  ;;  %23 = vst.msk [vmem:[#allocation2] sm:$0x3] %vm22_vm0, %v1505_v0  ;;  %24 = vst.msk [vmem:[#allocation3] sm:$0x3] %vm22_vm0, %v1505_v0  ;;  %v1555_v2 = vld [vmem:[%s1808_s1 + $0x8] sm:$0xff]  }
   0x2   :  { %1279 = vmatprep.subr.bf16.mxu1 %v1505_v0  ;;  %1283 = vmatprep.mubr.msk.bf16.mxu1 %vm1506_vm1, %v1505_v0  ;;  %v42_v3 = vld [vmem:[%s1810_s0] sm:$0x1]  ;;  %v1577_v5 = vld [vmem:[%s1809_s2 + $0x8] sm:$0xff]   ;;  %v1180_v26 = vld [vmem:[%s1810_s0 + $0x1] sm:$0x1]  ;;  %vm203_vm3 = vcmask 253952  }
   0x3   :  { %1264 = vmatpush3.bf16.msra.mxu0 %v1540_v1  ;;  %1280 = vmatpush3.bf16.msra.mxu1 %v1540_v1  ;;  %v1567_v4 = vld [vmem:[%s1809_s2] sm:$0xff]  }
   0x4   :  { %1265 = vmatprep.subr.bf16.mxu0 %v1505_v0  ;;  %1281 = vmatprep.subr.bf16.mxu1 %v1505_v0  ;;  %v1594_v8 = vld [vmem:[%s1811_s3] ss:$0 sm:$0xff]  ;;  %v1185_v47 = vld [vmem:[%s1810_s0 + $0x2] sm:$0x1] }
   0x7   :  { %1266 = vmatpush3.bf16.msra.mxu0 %v1555_v2  ;;  %1282 = vmatpush3.bf16.msra.mxu1 %v1555_v2 }
   0x8   :  { %1271 = vmatprep.subr.bf16.mxu0 %v1505_v0  ;;  %1287 = vmatprep.subr.bf16.mxu1 %v1505_v0  ;;  %v40_v6 = vld [vmem:[#allocation2] sm:$0x3]  ;;  %v41_v15 = vld [vmem:[#allocation3] sm:$0x3] }
   0x9   :  { %v99_v7 = vpack.c.bf16 %v40_v6, %v40_v6 }
   0xa   :  { %1268 = vmatmul.mubr.msk.bf16.vlgmr.msra.gmra.mrb[0].mxu0 %vm55_vm2, %v42_v3  ;;  %1284 = vmatmul.mubr.msk.bf16.vlgmr.msra.gmra.mrb[0].mxu1 %vm55_vm2, %v1180_v26 }
   0xb   :  { %1272 = vmatpush3.bf16.msra.mxu0 %v1567_v4  ;;  %1275 = vmatprep.mubr.msk.bf16.mxu0 %vm1506_vm1, %v1505_v0 }
   0xc   :  { %1273 = vmatprep.subr.bf16.mxu0 %v1505_v0  ;;  %1288 = vmatpush3.bf16.msra.mxu1 %v1567_v4 }
   0xd   :  { %1291 = vmatprep.mubr.msk.bf16.mxu1 %vm1506_vm1, %v1505_v0  ;;  %1289 = vmatprep.subr.bf16.mxu1 %v1505_v0 }
   0xf   :  { %1274 = vmatpush3.bf16.msra.mxu0 %v1577_v5 }
  0x10   :  { %1295 = vmatprep.subr.bf16.mxu0 %v1505_v0  ;;  %1290 = vmatpush3.bf16.msra.mxu1 %v1577_v5 }
  0x11   :  { %1311 = vmatprep.subr.bf16.mxu1 %v1505_v0 }
  0x16   :  { %1276 = vmatmul.mubr.msk.bf16.vlgmr.msra.gmra.mrb[0].mxu0 %vm55_vm2, %v99_v7 }
  0x17   :  { %1296 = vmatpush3.bf16.msra.mxu0 %v1540_v1  ;;  %1299 = vmatprep.mubr.msk.bf16.mxu0 %vm1506_vm1, %v1505_v0 }
  0x18   :  { %1297 = vmatprep.subr.bf16.mxu0 %v1505_v0 }
  0x1b   :  { %1298 = vmatpush3.bf16.msra.mxu0 %v1555_v2 }
  0x1c   :  { %1303 = vmatprep.subr.bf16.mxu0 %v1505_v0 }
  0x1e   :  { %1300 = vmatmul.mubr.msk.bf16.vlgmr.msra.gmra.mrb[4].mxu0 %vm55_vm2, %v1185_v47 }
  0x1f   :  { %1304 = vmatpush3.bf16.msra.mxu0 %v1567_v4  ;;  %1307 = vmatprep.mubr.msk.bf16.mxu0 %vm1506_vm1, %v1505_v0 }
  0x20   :  { %1305 = vmatprep.subr.bf16.mxu0 %v1505_v0 }
  0x23   :  { %1306 = vmatpush3.bf16.msra.mxu0 %v1577_v5 }
  0x24   :  { %1327 = vmatprep.subr.bf16.mxu0 %v1505_v0 }
  0xe9   :  { %v149_v9 = vpop.f32.mrb[0].mxu0 }
  0xea   :  { %v1391_v10 = vadd.f32 %v1594_v8, %v149_v9  ;;  %v1277_v11 = vpop.f32.mrb[1].mxu0 }
  0xeb   :  { %v152_v12 = vpop.f32.mrb[2].mxu0 }
  0xec   :  { %1441 = vtanh.f32 %v1391_v10  ;;  %v1278_v13 = vpop.f32.mrb[3].mxu0  ;;  %v1179_v16 = vmul.f32 -1.442695, %v1391_v10  ;;  %v1190_v10 = vld [vmem:[%s1810_s0 + $0x3] sm:$0x1] }
  0xee   :  { %1443 = vpow2.f32 %v1179_v16 }
  0xf6   :  { %v1442_v14 = vpop.eup %1441 }
  0xf7   :  { %169 = vrot.lane.b32.xlu0 %v1442_v14, %s1507_s25 }
  0xf8   :  { %v1444_v17 = vpop.eup %1443 }
  0xf9   :  { %v159_v18 = vadd.f32 1.0, %v1444_v17 }
  0xfb   :  { %164 = vrot.lane.b32.xlu0 %v41_v15, %s1507_s25  ;;  %1445 = vrcp.f32 %v159_v18 }
 0x105   :  { %v1446_v19 = vpop.eup %1445 }
 0x169   :  { %v170_v20 = vpop.permute.xlu0 %169 }
 0x16a   :  { %v172_v21 = vmul.f32 %v1446_v19, %v170_v20 }
 0x16c   :  { %174 = vrot.lane.b32.xlu1 %v172_v21, %s1507_s25 }
 0x16d   :  { %v165_v22 = vpop.permute.xlu0 %164 }
 0x16e   :  { %v167_v23 = vmul.f32 %v1446_v19, %v165_v22 }
 0x1de   :  { %v175_v24 = vpop.permute.xlu1 %174 }
 0x1df   :  { %v177_v25 = vadd.f32 %v175_v24, %v167_v23 }
 0x1e1   :  { %1447 = vtanh.f32 %v177_v25 }
 0x1eb   :  { %v1448_v27 = vpop.eup %1447 }
 0x1ec   :  { %180 = vrot.lane.b32.xlu1 %v1448_v27, %s1507_s25 }
 0x25e   :  { %v181_v28 = vpop.permute.xlu1 %180 }
 0x25f   :  { %v183_v29 = vmul.f32 %v1446_v19, %v181_v28 }
 0x261   :  { %v1611_v30 = vpack.c.bf16 %v183_v29, %v183_v29 }
 0x263   :  { %250 = vrot.lane.b32.xlu0 %v1611_v30, %s1508_s27 }
 0x2d5   :  { %v251_v31 = vpop.permute.xlu0 %250 }
 0x2d6   :  { %1292 = vmatmul.mubr.msk.bf16.vlgmr.msra.gmra.mrb[0].mxu1 %vm55_vm2, %v251_v31 }
 0x2d7   :  { %1312 = vmatpush3.bf16.msra.mxu1 %v1540_v1  ;;  %1315 = vmatprep.mubr.msk.bf16.mxu1 %vm1506_vm1, %v1505_v0 }
 0x2d8   :  { %1313 = vmatprep.subr.bf16.mxu1 %v1505_v0 }
 0x2db   :  { %1314 = vmatpush3.bf16.msra.mxu1 %v1555_v2 }
 0x2dc   :  { %1319 = vmatprep.subr.bf16.mxu1 %v1505_v0 }
 0x2de   :  { %1316 = vmatmul.mubr.msk.bf16.vlgmr.msra.gmra.mrb[4].mxu1 %vm55_vm2, %v1190_v10 }
 0x2df   :  { %1320 = vmatpush3.bf16.msra.mxu1 %v1567_v4  ;;  %1323 = vmatprep.mubr.msk.bf16.mxu1 %vm1506_vm1, %v1505_v0 }
 0x2e0   :  { %1321 = vmatprep.subr.bf16.mxu1 %v1505_v0 }
 0x2e3   :  { %1322 = vmatpush3.bf16.msra.mxu1 %v1577_v5 }
 0x2e4   :  { %1343 = vmatprep.subr.bf16.mxu1 %v1505_v0 }
 0x3a9   :  { %v289_v32 = vpop.f32.mrb[0].mxu1 }
 0x3aa   :  { %v1392_v33 = vadd.f32 %v1594_v8, %v289_v32  ;;  %v1293_v34 = vpop.f32.mrb[1].mxu1  ;;  %v1195_v32 = vld [vmem:[%s1810_s0 + $0x4] sm:$0x1] }
 0x3ab   :  { %v292_v35 = vpop.f32.mrb[2].mxu1 }
 0x3ac   :  { %1449 = vtanh.f32 %v1392_v33  ;;  %v1294_v36 = vpop.f32.mrb[3].mxu1  ;;  %v1183_v38 = vmul.f32 -1.442695, %v1392_v33 }
 0x3ae   :  { %1451 = vpow2.f32 %v1183_v38 }
 0x3b6   :  { %v1450_v37 = vpop.eup %1449 }
 0x3b7   :  { %305 = vrot.lane.b32.xlu1 %v1450_v37, %s1507_s25 }
 0x3b8   :  { %v1452_v39 = vpop.eup %1451 }
 0x3b9   :  { %v299_v40 = vadd.f32 1.0, %v1452_v39 }
 0x3bb   :  { %1453 = vrcp.f32 %v299_v40 }
 0x3c5   :  { %v1454_v41 = vpop.eup %1453 }
 0x3c6   :  { %v303_v44 = vmul.f32 %v1454_v41, %v177_v25 }
 0x429   :  { %v306_v42 = vpop.permute.xlu1 %305 }
 0x42a   :  { %v308_v43 = vmul.f32 %v1454_v41, %v306_v42 }
 0x42c   :  { %310 = vrot.lane.b32.xlu0 %v308_v43, %s1507_s25 }
 0x49e   :  { %v311_v45 = vpop.permute.xlu0 %310 }
 0x49f   :  { %v313_v46 = vadd.f32 %v311_v45, %v303_v44 }
 0x4a1   :  { %1455 = vtanh.f32 %v313_v46 }
 0x4ab   :  { %v1456_v48 = vpop.eup %1455 }
 0x4ac   :  { %316 = vrot.lane.b32.xlu1 %v1456_v48, %s1507_s25 }
 0x51e   :  { %v317_v49 = vpop.permute.xlu1 %316 }
 0x51f   :  { %v319_v50 = vmul.f32 %v1454_v41, %v317_v49 }
 0x521   :  { %v1636_v51 = vpack.c.bf16 %v319_v50, %v319_v50 }
 0x523   :  { %386 = vrot.lane.b32.xlu0 %v1636_v51, %s1508_s27 }
 0x595   :  { %v387_v52 = vpop.permute.xlu0 %386 }
 0x596   :  { %1308 = vmatmul.mubr.msk.bf16.vlgmr.msra.gmra.mrb[4].mxu0 %vm55_vm2, %v387_v52 }
 0x597   :  { %1328 = vmatpush3.bf16.msra.mxu0 %v1540_v1  ;;  %1331 = vmatprep.mubr.msk.bf16.mxu0 %vm1506_vm1, %v1505_v0 }
 0x598   :  { %1329 = vmatprep.subr.bf16.mxu0 %v1505_v0 }
 0x59b   :  { %1330 = vmatpush3.bf16.msra.mxu0 %v1555_v2 }
 0x59c   :  { %1335 = vmatprep.subr.bf16.mxu0 %v1505_v0 }
 0x59e   :  { %1332 = vmatmul.mubr.msk.bf16.vlgmr.msra.gmra.mrb[8].mxu0 %vm55_vm2, %v1195_v32 }
 0x59f   :  { %1336 = vmatpush3.bf16.msra.mxu0 %v1567_v4  ;;  %1339 = vmatprep.mubr.msk.bf16.mxu0 %vm1506_vm1, %v1505_v0 }
 0x5a0   :  { %1337 = vmatprep.subr.bf16.mxu0 %v1505_v0 }
 0x5a3   :  { %1338 = vmatpush3.bf16.msra.mxu0 %v1577_v5 }
 0x5a4   :  { %1359 = vmatprep.subr.bf16.mxu0 %v1505_v0 }
 0x669   :  { %v425_v53 = vpop.f32.mrb[4].mxu0 }
 0x66a   :  { %v1393_v54 = vadd.f32 %v1594_v8, %v425_v53  ;;  %v1309_v55 = vpop.f32.mrb[5].mxu0 }
 0x66b   :  { %v428_v56 = vpop.f32.mrb[6].mxu0 }
 0x66c   :  { %1457 = vtanh.f32 %v1393_v54  ;;  %v1310_v57 = vpop.f32.mrb[7].mxu0  ;;  %v1188_v59 = vmul.f32 -1.442695, %v1393_v54  ;;  %v1200_v54 = vld [vmem:[%s1810_s0 + $0x5] sm:$0x1] }
 0x66e   :  { %1459 = vpow2.f32 %v1188_v59 }
 0x676   :  { %v1458_v58 = vpop.eup %1457 }
 0x677   :  { %441 = vrot.lane.b32.xlu1 %v1458_v58, %s1507_s25 }
 0x678   :  { %v1460_v60 = vpop.eup %1459 }
 0x679   :  { %v435_v61 = vadd.f32 1.0, %v1460_v60 }
 0x67b   :  { %1461 = vrcp.f32 %v435_v61 }
 0x685   :  { %v1462_v62 = vpop.eup %1461 }
 0x686   :  { %v439_v6 = vmul.f32 %v1462_v62, %v313_v46 }
 0x6e9   :  { %v442_v63 = vpop.permute.xlu1 %441 }
 0x6ea   :  { %v444_v3 = vmul.f32 %v1462_v62, %v442_v63 }
 0x6ec   :  { %446 = vrot.lane.b32.xlu0 %v444_v3, %s1507_s25 }
 0x75e   :  { %v447_v7 = vpop.permute.xlu0 %446 }
 0x75f   :  { %v449_v9 = vadd.f32 %v447_v7, %v439_v6 }
 0x761   :  { %1463 = vtanh.f32 %v449_v9 }
 0x76b   :  { %v1464_v11 = vpop.eup %1463 }
 0x76c   :  { %452 = vrot.lane.b32.xlu1 %v1464_v11, %s1507_s25 }
 0x7de   :  { %v453_v12 = vpop.permute.xlu1 %452 }
 0x7df   :  { %v455_v13 = vmul.f32 %v1462_v62, %v453_v12 }
 0x7e1   :  { %v1661_v14 = vpack.c.bf16 %v455_v13, %v455_v13 }
 0x7e3   :  { %522 = vrot.lane.b32.xlu0 %v1661_v14, %s1508_s27 }
 0x855   :  { %v523_v15 = vpop.permute.xlu0 %522 }
 0x856   :  { %1324 = vmatmul.mubr.msk.bf16.vlgmr.msra.gmra.mrb[4].mxu1 %vm55_vm2, %v523_v15 }
 0x857   :  { %1344 = vmatpush3.bf16.msra.mxu1 %v1540_v1  ;;  %1347 = vmatprep.mubr.msk.bf16.mxu1 %vm1506_vm1, %v1505_v0 }
 0x858   :  { %1345 = vmatprep.subr.bf16.mxu1 %v1505_v0 }
 0x85b   :  { %1346 = vmatpush3.bf16.msra.mxu1 %v1555_v2 }
 0x85c   :  { %1351 = vmatprep.subr.bf16.mxu1 %v1505_v0 }
 0x85e   :  { %1348 = vmatmul.mubr.msk.bf16.vlgmr.msra.gmra.mrb[8].mxu1 %vm55_vm2, %v1200_v54  ;;  %v189_v54 = vlaneseq }
 0x85f   :  { %1352 = vmatpush3.bf16.msra.mxu1 %v1567_v4  ;;  %1355 = vmatprep.mubr.msk.bf16.mxu1 %vm1506_vm1, %v1505_v0 }
 0x860   :  { %1353 = vmatprep.subr.bf16.mxu1 %v1505_v0 }
 0x863   :  { %1354 = vmatpush3.bf16.msra.mxu1 %v1577_v5 }
 0x864   :  { %1375 = vmatprep.subr.bf16.mxu1 %v1505_v0 }
 0x929   :  { %v561_v16 = vpop.f32.mrb[4].mxu1 }
 0x92a   :  { %v1394_v17 = vadd.f32 %v1594_v8, %v561_v16  ;;  %v1325_v18 = vpop.f32.mrb[5].mxu1  ;;  %v1205_v16 = vld [vmem:[%s1810_s0 + $0x6] sm:$0x1] }
 0x92b   :  { %v564_v19 = vpop.f32.mrb[6].mxu1 }
 0x92c   :  { %1465 = vtanh.f32 %v1394_v17  ;;  %v1326_v20 = vpop.f32.mrb[7].mxu1  ;;  %v1193_v22 = vmul.f32 -1.442695, %v1394_v17 }
 0x92e   :  { %1467 = vpow2.f32 %v1193_v22 }
 0x936   :  { %v1466_v21 = vpop.eup %1465 }
 0x937   :  { %577 = vrot.lane.b32.xlu1 %v1466_v21, %s1507_s25 }
 0x938   :  { %v1468_v23 = vpop.eup %1467 }
 0x939   :  { %v571_v24 = vadd.f32 1.0, %v1468_v23 }
 0x93b   :  { %1469 = vrcp.f32 %v571_v24 }
 0x945   :  { %v1470_v25 = vpop.eup %1469 }
 0x946   :  { %v575_v28 = vmul.f32 %v1470_v25, %v449_v9 }
 0x9a9   :  { %v578_v26 = vpop.permute.xlu1 %577 }
 0x9aa   :  { %v580_v27 = vmul.f32 %v1470_v25, %v578_v26 }
 0x9ac   :  { %582 = vrot.lane.b32.xlu0 %v580_v27, %s1507_s25 }
 0xa1e   :  { %v583_v29 = vpop.permute.xlu0 %582 }
 0xa1f   :  { %v585_v31 = vadd.f32 %v583_v29, %v575_v28 }
 0xa21   :  { %1471 = vtanh.f32 %v585_v31 }
 0xa2b   :  { %v1472_v33 = vpop.eup %1471 }
 0xa2c   :  { %588 = vrot.lane.b32.xlu1 %v1472_v33, %s1507_s25 }
 0xa9e   :  { %v589_v34 = vpop.permute.xlu1 %588 }
 0xa9f   :  { %v591_v35 = vmul.f32 %v1470_v25, %v589_v34 }
 0xaa1   :  { %v1686_v36 = vpack.c.bf16 %v591_v35, %v591_v35 }
 0xaa3   :  { %658 = vrot.lane.b32.xlu0 %v1686_v36, %s1508_s27 }
 0xb15   :  { %v659_v37 = vpop.permute.xlu0 %658 }
 0xb16   :  { %1340 = vmatmul.mubr.msk.bf16.vlgmr.msra.gmra.mrb[8].mxu0 %vm55_vm2, %v659_v37 }
 0xb17   :  { %1360 = vmatpush3.bf16.msra.mxu0 %v1540_v1  ;;  %1363 = vmatprep.mubr.msk.bf16.mxu0 %vm1506_vm1, %v1505_v0 }
 0xb18   :  { %1361 = vmatprep.subr.bf16.mxu0 %v1505_v0 }
 0xb1b   :  { %1362 = vmatpush3.bf16.msra.mxu0 %v1555_v2 }
 0xb1c   :  { %1367 = vmatprep.subr.bf16.mxu0 %v1505_v0 }
 0xb1e   :  { %1364 = vmatmul.mubr.msk.bf16.vlgmr.msra.gmra.mrb[12].mxu0 %vm55_vm2, %v1205_v16 }
 0xb1f   :  { %1368 = vmatpush3.bf16.msra.mxu0 %v1567_v4  ;;  %1371 = vmatprep.mubr.msk.bf16.mxu0 %vm1506_vm1, %v1505_v0 }
 0xb20   :  { %1369 = vmatprep.subr.bf16.mxu0 %v1505_v0 }
 0xb23   :  { %1370 = vmatpush3.bf16.msra.mxu0 %v1577_v5 }
 0xbe9   :  { %v697_v38 = vpop.f32.mrb[8].mxu0 }
 0xbea   :  { %v1395_v39 = vadd.f32 %v1594_v8, %v697_v38  ;;  %v1341_v40 = vpop.f32.mrb[9].mxu0 }
 0xbeb   :  { %v700_v41 = vpop.f32.mrb[10].mxu0 }
 0xbec   :  { %1473 = vtanh.f32 %v1395_v39  ;;  %v1342_v42 = vpop.f32.mrb[11].mxu0  ;;  %v1198_v44 = vmul.f32 -1.442695, %v1395_v39  ;;  %v1210_v39 = vld [vmem:[%s1810_s0 + $0x7] sm:$0x1] }
 0xbee   :  { %1475 = vpow2.f32 %v1198_v44 }
 0xbf6   :  { %v1474_v43 = vpop.eup %1473 }
 0xbf7   :  { %713 = vrot.lane.b32.xlu1 %v1474_v43, %s1507_s25 }
 0xbf8   :  { %v1476_v45 = vpop.eup %1475 }
 0xbf9   :  { %v707_v46 = vadd.f32 1.0, %v1476_v45 }
 0xbfb   :  { %1477 = vrcp.f32 %v707_v46 }
 0xc05   :  { %v1478_v47 = vpop.eup %1477 }
 0xc06   :  { %v711_v50 = vmul.f32 %v1478_v47, %v585_v31 }
 0xc69   :  { %v714_v48 = vpop.permute.xlu1 %713 }
 0xc6a   :  { %v716_v49 = vmul.f32 %v1478_v47, %v714_v48 }
 0xc6c   :  { %718 = vrot.lane.b32.xlu0 %v716_v49, %s1507_s25 }
 0xcde   :  { %v719_v52 = vpop.permute.xlu0 %718 }
 0xcdf   :  { %v721_v53 = vadd.f32 %v719_v52, %v711_v50  ;;  %v1509_v52 = vmov 1966171168  }
 0xce1   :  { %1479 = vtanh.f32 %v721_v53 }
 0xceb   :  { %v1480_v55 = vpop.eup %1479 }
 0xcec   :  { %724 = vrot.lane.b32.xlu1 %v1480_v55, %s1507_s25 }
 0xd5e   :  { %v725_v56 = vpop.permute.xlu1 %724 }
 0xd5f   :  { %v727_v57 = vmul.f32 %v1478_v47, %v725_v56  ;;  %v190_v56 = vshrl.u32 %v189_v54, 7 }
 0xd61   :  { %v1711_v58 = vpack.c.bf16 %v727_v57, %v727_v57 }
 0xd63   :  { %794 = vrot.lane.b32.xlu0 %v1711_v58, %s1508_s27 }
 0xdd5   :  { %v795_v59 = vpop.permute.xlu0 %794 }
 0xdd6   :  { %1356 = vmatmul.mubr.msk.bf16.vlgmr.msra.gmra.mrb[8].mxu1 %vm55_vm2, %v795_v59 }
 0xdd7   :  { %1376 = vmatpush3.bf16.msra.mxu1 %v1540_v1  ;;  %1379 = vmatprep.mubr.msk.bf16.mxu1 %vm1506_vm1, %v1505_v0 }
 0xdd8   :  { %1377 = vmatprep.subr.bf16.mxu1 %v1505_v0 }
 0xddb   :  { %1378 = vmatpush3.bf16.msra.mxu1 %v1555_v2 }
 0xddc   :  { %1383 = vmatprep.subr.bf16.mxu1 %v1505_v0 }
 0xdde   :  { %1380 = vmatmul.mubr.msk.bf16.vlgmr.msra.gmra.mrb[12].mxu1 %vm55_vm2, %v1210_v39 }
 0xddf   :  { %1384 = vmatpush3.bf16.msra.mxu1 %v1567_v4  ;;  %1387 = vmatprep.mubr.msk.bf16.mxu1 %vm1506_vm1, %v1505_v0 }
 0xde0   :  { %1385 = vmatprep.subr.bf16.mxu1 %v1505_v0 }
 0xde3   :  { %1386 = vmatpush3.bf16.msra.mxu1 %v1577_v5 }
 0xea9   :  { %v833_v60 = vpop.f32.mrb[8].mxu1 }
 0xeaa   :  { %v1396_v61 = vadd.f32 %v1594_v8, %v833_v60  ;;  %v1357_v62 = vpop.f32.mrb[9].mxu1 }
 0xeab   :  { %v836_v63 = vpop.f32.mrb[10].mxu1 }
 0xeac   :  { %1481 = vtanh.f32 %v1396_v61  ;;  %v1358_v3 = vpop.f32.mrb[11].mxu1  ;;  %v1203_v1 = vmul.f32 -1.442695, %v1396_v61 }
 0xeae   :  { %1483 = vpow2.f32 %v1203_v1 }
 0xeb6   :  { %v1482_v6 = vpop.eup %1481 }
 0xeb7   :  { %849 = vrot.lane.b32.xlu1 %v1482_v6, %s1507_s25 }
 0xeb8   :  { %v1484_v7 = vpop.eup %1483 }
 0xeb9   :  { %v843_v9 = vadd.f32 1.0, %v1484_v7 }
 0xebb   :  { %1485 = vrcp.f32 %v843_v9 }
 0xec5   :  { %v1486_v10 = vpop.eup %1485 }
 0xec6   :  { %v847_v12 = vmul.f32 %v1486_v10, %v721_v53  ;;  %v187_v53 = vunpack.c.l.s4 %v1509_v52 }
 0xec8   :  { %v188_v55 = vunpack.c.0.s8 %v187_v53 }
 0xeca   :  { %v191_v57 = vsub.s32 %v188_v55, %v190_v56 }
 0xecc   :  { %v192_v60 = vrot.slane %v1611_v30, %v191_v57  ;;  %v464_v62 = vrot.slane %v1661_v14, %v191_v57  ;;  %v736_v3 = vrot.slane %v1711_v58, %v191_v57 }
 0xece   :  { %v199_v63 = vrot.slane %v192_v60, %v191_v57  ;;  %v471_v6 = vrot.slane %v464_v62, %v191_v57  ;;  %v743_v7 = vrot.slane %v736_v3, %v191_v57 }
 0xf29   :  { %v850_v11 = vpop.permute.xlu1 %849 }
 0xf2a   :  { %v852_v2 = vmul.f32 %v1486_v10, %v850_v11 }
 0xf2c   :  { %854 = vrot.lane.b32.xlu0 %v852_v2, %s1507_s25  ;;  %v328_v2 = vrot.slane %v1636_v51, %v191_v57 }
 0xf9e   :  { %v855_v13 = vpop.permute.xlu0 %854 }
 0xf9f   :  { %v857_v15 = vadd.f32 %v855_v13, %v847_v12 }
 0xfa1   :  { %1487 = vtanh.f32 %v857_v15 }
 0xfab   :  { %v1488_v17 = vpop.eup %1487 }
 0xfac   :  { %860 = vrot.lane.b32.xlu1 %v1488_v17, %s1507_s25  ;;  %v335_v17 = vrot.slane %v328_v2, %v191_v57 }
0x101e   :  { %v861_v18 = vpop.permute.xlu1 %860 }
0x101f   :  { %v863_v19 = vmul.f32 %v1486_v10, %v861_v18 }
0x1021   :  { %v1735_v20 = vpack.c.bf16 %v863_v19, %v863_v19 }
0x1023   :  { %930 = vrot.lane.b32.xlu0 %v1735_v20, %s1508_s27  ;;  %v872_v51 = vrot.slane %v1735_v20, %v191_v57 }
0x1025   :  { %v879_v19 = vrot.slane %v872_v51, %v191_v57 }
0x1095   :  { %v931_v21 = vpop.permute.xlu0 %930 }
0x1096   :  { %1372 = vmatmul.mubr.msk.bf16.vlgmr.msra.gmra.mrb[12].mxu0 %vm55_vm2, %v931_v21 }
0x1169   :  { %v969_v22 = vpop.f32.mrb[12].mxu0 }
0x116a   :  { %v1397_v23 = vadd.f32 %v1594_v8, %v969_v22  ;;  %v1373_v24 = vpop.f32.mrb[13].mxu0 }
0x116b   :  { %v972_v25 = vpop.f32.mrb[14].mxu0 }
0x116c   :  { %1489 = vtanh.f32 %v1397_v23  ;;  %v1374_v26 = vpop.f32.mrb[15].mxu0  ;;  %v1208_v28 = vmul.f32 -1.442695, %v1397_v23 }
0x116e   :  { %1491 = vpow2.f32 %v1208_v28 }
0x1176   :  { %v1490_v27 = vpop.eup %1489 }
0x1177   :  { %985 = vrot.lane.b32.xlu1 %v1490_v27, %s1507_s25 }
0x1178   :  { %v1492_v29 = vpop.eup %1491 }
0x1179   :  { %v979_v31 = vadd.f32 1.0, %v1492_v29 }
0x117b   :  { %1493 = vrcp.f32 %v979_v31 }
0x1185   :  { %v1494_v32 = vpop.eup %1493 }
0x1186   :  { %v983_v35 = vmul.f32 %v1494_v32, %v857_v15  ;;  %v600_v15 = vrot.slane %v1686_v36, %v191_v57 }
0x1188   :  { %v607_v18 = vrot.slane %v600_v15, %v191_v57 }
0x11e9   :  { %v986_v33 = vpop.permute.xlu1 %985 }
0x11ea   :  { %v988_v34 = vmul.f32 %v1494_v32, %v986_v33 }
0x11ec   :  { %990 = vrot.lane.b32.xlu0 %v988_v34, %s1507_s25 }
0x125e   :  { %v991_v37 = vpop.permute.xlu0 %990 }
0x125f   :  { %v993_v38 = vadd.f32 %v991_v37, %v983_v35 }
0x1261   :  { %1495 = vtanh.f32 %v993_v38 }
0x126b   :  { %v1496_v40 = vpop.eup %1495 }
0x126c   :  { %996 = vrot.lane.b32.xlu1 %v1496_v40, %s1507_s25 }
0x12de   :  { %v997_v41 = vpop.permute.xlu1 %996 }
0x12df   :  { %v999_v42 = vmul.f32 %v1494_v32, %v997_v41 }
0x12e1   :  { %v1000_v43 = vpack.c.bf16 %v999_v42, %v999_v42 }
0x12e3   :  { %1066 = vrot.lane.b32.xlu0 %v1000_v43, %s1508_s27  ;;  %v1008_v1 = vrot.slane %v1000_v43, %v191_v57 }
0x12e5   :  { %v1015_v9 = vrot.slane %v1008_v1, %v191_v57 }
0x1355   :  { %v1067_v44 = vpop.permute.xlu0 %1066 }
0x1356   :  { %1388 = vmatmul.mubr.msk.bf16.vlgmr.msra.gmra.mrb[12].mxu1 %vm55_vm2, %v1067_v44 }
0x1429   :  { %v1105_v45 = vpop.f32.mrb[12].mxu1 }
0x142a   :  { %v1398_v4 = vadd.f32 %v1594_v8, %v1105_v45  ;;  %v1389_v46 = vpop.f32.mrb[13].mxu1 }
0x142b   :  { %v1108_v47 = vpop.f32.mrb[14].mxu1 }
0x142c   :  { %1497 = vtanh.f32 %v1398_v4  ;;  %v1390_v0 = vpop.f32.mrb[15].mxu1  ;;  %v1213_v5 = vmul.f32 -1.442695, %v1398_v4 }
0x142e   :  { %1499 = vpow2.f32 %v1213_v5 }
0x1436   :  { %v1498_v48 = vpop.eup %1497 }
0x1437   :  { %1121 = vrot.lane.b32.xlu1 %v1498_v48, %s1507_s25 }
0x1438   :  { %v1500_v49 = vpop.eup %1499 }
0x1439   :  { %v1115_v50 = vadd.f32 1.0, %v1500_v49 }
0x143b   :  { %1501 = vrcp.f32 %v1115_v50 }
0x1445   :  { %v1502_v59 = vpop.eup %1501 }
0x1446   :  { %v1119_v30 = vmul.f32 %v1502_v59, %v993_v38 }
0x14a9   :  { %v1122_v8 = vpop.permute.xlu1 %1121 }
0x14aa   :  { %v1124_v61 = vmul.f32 %v1502_v59, %v1122_v8 }
0x14ac   :  { %1126 = vrot.lane.b32.xlu0 %v1124_v61, %s1507_s25 }
0x14b0   :  { %200 = vrot.lane.b32.xlu0 %v199_v63, %s1508_s27 }
0x14b4   :  { %472 = vrot.lane.b32.xlu0 %v471_v6, %s1508_s27 }
0x14b8   :  { %744 = vrot.lane.b32.xlu0 %v743_v7, %s1508_s27 }
0x14bc   :  { %1016 = vrot.lane.b32.xlu0 %v1015_v9, %s1508_s27 }
0x151e   :  { %v1127_v10 = vpop.permute.xlu0 %1126 }
0x151f   :  { %v1129_v11 = vadd.f32 %v1127_v10, %v1119_v30 }
0x1521   :  { %1503 = vtanh.f32 %v1129_v11 }
0x1522   :  { %v201_v14 = vpop.permute.xlu0 %200 }
0x1523   :  { %204 = vst.msk [vmem:[%s1812_s4] sm:$0x1] %vm203_vm3, %v201_v14 }
0x1526   :  { %v473_v58 = vpop.permute.xlu0 %472 }
0x1527   :  { %1189 = vst.msk [vmem:[%s1812_s4 + $0x2] sm:$0x1] %vm203_vm3, %v473_v58 }
0x152a   :  { %v745_v12 = vpop.permute.xlu0 %744 }
0x152b   :  { %v1504_v13 = vpop.eup %1503  ;;  %1199 = vst.msk [vmem:[%s1812_s4 + $0x4] sm:$0x1] %vm203_vm3, %v745_v12 }
0x152c   :  { %1132 = vrot.lane.b32.xlu1 %v1504_v13, %s1507_s25  ;;  %s1510_s25 = smov 96  }
0x152e   :  { %v1017_v16 = vpop.permute.xlu0 %1016 }
0x152f   :  { %1209 = vst.msk [vmem:[%s1812_s4 + $0x6] sm:$0x1] %vm203_vm3, %v1017_v16 }
0x1530   :  { %336 = vrot.lane.b32.xlu1 %v335_v17, %s1508_s27 }
0x1534   :  { %608 = vrot.lane.b32.xlu1 %v607_v18, %s1508_s27 }
0x1538   :  { %880 = vrot.lane.b32.xlu1 %v879_v19, %s1508_s27 }
0x159e   :  { %v1133_v21 = vpop.permute.xlu1 %1132 }
0x159f   :  { %v1135_v22 = vmul.f32 %v1502_v59, %v1133_v21 }
0x15a1   :  { %v1136_v36 = vpack.c.bf16 %v1135_v22, %v1135_v22  ;;  %1158 = vrot.lane.b32.xlu0 %v1135_v22, %s1508_s27 }
0x15a2   :  { %v337_v23 = vpop.permute.xlu1 %336 }
0x15a3   :  { %v1144_v24 = vrot.slane %v1136_v36, %v191_v57  ;;  %1184 = vst.msk [vmem:[%s1812_s4 + $0x1] sm:$0x1] %vm203_vm3, %v337_v23 }
0x15a5   :  { %v1151_v25 = vrot.slane %v1144_v24, %v191_v57 }
0x15a6   :  { %v609_v20 = vpop.permute.xlu1 %608 }
0x15a7   :  { %1194 = vst.msk [vmem:[%s1812_s4 + $0x3] sm:$0x1] %vm203_vm3, %v609_v20  ;;  %1152 = vrot.lane.b32.xlu1 %v1151_v25, %s1508_s27 }
0x15aa   :  { %v881_v26 = vpop.permute.xlu1 %880 }
0x15ab   :  { %1204 = vst.msk [vmem:[%s1812_s4 + $0x5] sm:$0x1] %vm203_vm3, %v881_v26  ;;  %1164 = vrot.lane.b32.xlu1 %v1129_v11, %s1510_s25 }
0x1613   :  { %v1159_v27 = vpop.permute.xlu0 %1158 }
0x1614   :  { %1162 = vst.msk [vmem:[#allocation2] sm:$0x3] %vm22_vm0, %v1159_v27 }
0x1619   :  { %v1153_v28 = vpop.permute.xlu1 %1152 }
0x161a   :  { %1214 = vst.msk [vmem:[%s1812_s4 + $0x7] sm:$0x1] %vm203_vm3, %v1153_v28 }
0x161d   :  { %v1165_v29 = vpop.permute.xlu1 %1164 }
0x161e   :  { %1167 = vst.msk [vmem:[#allocation3] sm:$0x3] %vm22_vm0, %v1165_v29 }

</bundles_post_ra>
